<compile_context>
chip_gen: v5e
topology: v5e:2x2
jax: 0.10.0
libtpu: 0.0.40
codegen_flags: <defaults>
</compile_context>

<pallas_src>
import functools

import jax
import jax.numpy as jnp
from jax.experimental import pallas as pl
from jax.experimental.pallas import tpu as pltpu


def _conv_block_kernel(ph_ref, w_ref, scale_ref, shift_ref, o_ref, act_ref, *,
                       pad_pool, seq_len):
    """One batch tile (TB sequences) per grid step.

    ph_ref    : (TB, P, M, Ci)   phase-split, zero-padded raw input
    w_ref     : (K, Ci, Co)      conv weight, tap-major, bf16 (MXU operand)
    scale_ref : (1, Co)  f32     folded BN scale  = gamma / sqrt(var + eps)
    shift_ref : (1, Co)  f32     folded BN shift  = beta - mean * scale
    o_ref     : (TB, L_out, Co)  pooled output (Co padded to a lane multiple)
    act_ref   : (TB, P, M, Ci)   bf16 scratch, activated input phases
    """
    TB, P, M, Ci = act_ref.shape
    K = w_ref.shape[0]
    L_out, Co = o_ref.shape[1], o_ref.shape[2]

    # _GELU: x * sigmoid(1.702 x).  Math in f32 (v5e VPU has no bf16); the
    # divide goes to the EUP via the approximate reciprocal; cast to bf16 only
    # on the store so the conv matmuls below run on the fast bf16 MXU path.
    # act(0) == 0, so the zero rows added by the wrapper stay valid 'same'
    # conv padding.
    x = ph_ref[...].astype(jnp.float32)
    act = x * pl.reciprocal(1.0 + jnp.exp(-1.702 * x), approx=True)
    act_ref[...] = act.astype(jnp.bfloat16)

    # Hoisted loop invariants.
    scale = scale_ref[...]
    shift = shift_ref[...]
    need_mask = (pad_pool > 0) or (L_out * P > seq_len)
    if need_mask:
        # Output-row positions as a single (L_out, 1) column; broadcast along
        # lanes inside jnp.where instead of per-phase full-tile iotas.
        row = jax.lax.broadcasted_iota(jnp.int32, (L_out, 1), 0) * P

    # TODO(synk): fold the K taps into one (L_out, K*Ci) x (K*Ci, Co) im2col
    # contraction for the stem layer (C_in=4), where the per-tap depth is only
    # 8 and under-fills the systolic array.
    for b in range(TB):                        # batch tile (static, small)
        out = None
        for p in range(P):                     # pooling phase (static, small)
            acc = jnp.zeros((L_out, Co), jnp.float32)
            for k in range(K):                 # conv tap (static, small)
                r = (p + k) % P
                q = (p + k) // P
                lhs = act_ref[b, r, q:q + L_out, :]          # (L_out, Ci) bf16
                acc = acc + jnp.dot(lhs, w_ref[k],
                                    preferred_element_type=jnp.float32)
            # Eval-mode BatchNorm (must stay BEFORE the max: scale may be < 0).
            z = acc * scale + shift
            if need_mask:
                # MaxPool1d ceil_mode / padding positions contribute -inf.
                l_pos = row + (p - pad_pool)
                z = jnp.where((l_pos >= 0) & (l_pos < seq_len), z, -jnp.inf)
            out = z if out is None else jnp.maximum(out, z)
        o_ref[b] = out.astype(o_ref.dtype)


def conv_block_forward(x, weight, gamma, beta, running_mean, running_var, *,
                       pool_size=None, eps=1e-3, batch_tile=8):
    """scBasset _ConvBlock.forward (eval mode) as a single fused Pallas kernel.

    x      : (B, C_in, L)      input, PyTorch NCL layout
    weight : (C_out, C_in, K)  Conv1d weight (bias=False)
    gamma, beta, running_mean, running_var : (C_out,) BatchNorm1d parameters
    Returns (B, C_out, L_out).
    """
    B, C_in, L = x.shape
    C_out, _, K = weight.shape

    P = 1 if pool_size is None else int(pool_size)
    pad_pool = (P - 1) // 2
    left = (K - 1) // 2                       # torch Conv1d padding='same'

    # MaxPool1d output length (stride = pool_size, ceil_mode=True).
    L_out = -(-(L + 2 * pad_pool - P) // P) + 1
    if (L_out - 1) * P >= L + pad_pool:
        L_out -= 1

    # Batch tile: amortize per-grid-step overhead and enlarge DMA tiles.
    TB = max(1, min(int(batch_tile), B))
    B_pad = -(-B // TB) * TB                  # padded rows are discarded below

    # Channel padding:
    #  * Ci -> multiple of 8 (sublane-friendly; zero channels x zero weights
    #    contribute nothing).
    #  * Co -> multiple of 128 (lane-dense unmasked output stores, full MXU
    #    result tiles); extra channels are sliced off after the kernel.
    c_pad = (-C_in) % 8
    Ci = C_in + c_pad
    Co = -(-C_out // 128) * 128

    x_nlc = jnp.transpose(x, (0, 2, 1))                          # (B, L, C_in)
    if c_pad:
        x_nlc = jnp.pad(x_nlc, ((0, 0), (0, 0), (0, c_pad)))
        weight = jnp.pad(weight, ((0, 0), (0, c_pad), (0, 0)))

    # Zero-padded, phase-split input (XLA layout plumbing, done once):
    #   a_ext[b, pad_pool + left + l, :] = x[b, :, l]
    #   phases[b, r, m, :]               = a_ext[b, m * P + r, :]
    q_max = (P - 1 + K - 1) // P
    M = max(L_out + q_max, -(-(L + K - 1 + pad_pool) // P))
    a_ext = jnp.zeros((B_pad, M * P, Ci), x.dtype)
    a_ext = jax.lax.dynamic_update_slice(a_ext, x_nlc, (0, pad_pool + left, 0))
    phases = a_ext.reshape(B_pad, M, P, Ci).transpose(0, 2, 1, 3)  # (B_pad,P,M,Ci)

    # Tap-major bf16 conv weight (MXU operand) and folded eval-mode BN affine,
    # both zero-padded out to Co lanes.
    w_pad = jnp.pad(weight, ((0, Co - C_out), (0, 0), (0, 0)))   # (Co, Ci, K)
    w_t = jnp.transpose(w_pad, (2, 1, 0)).astype(jnp.bfloat16)   # (K, Ci, Co)
    scale = (gamma / jnp.sqrt(running_var + eps)).astype(jnp.float32)
    shift = (beta - running_mean * scale).astype(jnp.float32)
    scale = jnp.pad(scale, (0, Co - C_out)).reshape(1, Co)
    shift = jnp.pad(shift, (0, Co - C_out)).reshape(1, Co)

    kernel = functools.partial(_conv_block_kernel, pad_pool=pad_pool, seq_len=L)
    out_nlc = pl.pallas_call(
        kernel,
        out_shape=jax.ShapeDtypeStruct((B_pad, L_out, Co), x.dtype),
        grid=(B_pad // TB,),
        in_specs=[
            pl.BlockSpec((TB, P, M, Ci), lambda g: (g, 0, 0, 0)),
            # TODO(synk): single-buffer these grid-invariant operands (e.g.
            # pipeline_mode=pl.Buffered(1) or a one-time DMA into persistent
            # scratch) once real scBasset widths make the duplicate weight
            # buffer matter for the VMEM budget.
            pl.BlockSpec((K, Ci, Co), lambda g: (0, 0, 0)),
            pl.BlockSpec((1, Co), lambda g: (0, 0)),
            pl.BlockSpec((1, Co), lambda g: (0, 0)),
        ],
        out_specs=pl.BlockSpec((TB, L_out, Co), lambda g: (g, 0, 0)),
        scratch_shapes=[pltpu.VMEM((TB, P, M, Ci), jnp.bfloat16)],
        compiler_params=pltpu.CompilerParams(
            dimension_semantics=("parallel",),       # megacore split on v7x
            vmem_limit_bytes=48 * 1024 * 1024),      # fits v7x's 64 MiB VMEM
    )(phases, w_t, scale, shift)

    # TODO(synk): Dropout with p > 0 (training) and BatchNorm training-mode
    # batch statistics are not implemented; this is the eval-mode forward.
    # TODO(synk): when stacking _ConvBlocks, keep the lane-padded (B, L, C)
    # layout between layers and fold the phase split into the previous layer's
    # output to avoid the per-layer transpose/pad HBM round-trips done here.
    out_nlc = out_nlc[:B, :, :C_out]
    return jnp.transpose(out_nlc, (0, 2, 1))                     # (B, C_out, L_out)


def _ref_conv_block(x, weight, gamma, beta, running_mean, running_var, *,
                    pool_size=None, eps=1e-3):
    """Pure-JAX reference of the PyTorch _ConvBlock eval-mode forward."""
    a = x * (1.0 / (1.0 + jnp.exp(-1.702 * x)))
    K = weight.shape[-1]
    left = (K - 1) // 2
    right = K - 1 - left
    y = jax.lax.conv_general_dilated(
        a, weight, window_strides=(1,), padding=[(left, right)],
        dimension_numbers=("NCH", "OIH", "NCH"))
    scale = gamma / jnp.sqrt(running_var + eps)
    shift = beta - running_mean * scale
    y = y * scale[None, :, None] + shift[None, :, None]
    if pool_size is None:
        return y
    P = int(pool_size)
    pad = (P - 1) // 2
    B, C, L = y.shape
    L_out = -(-(L + 2 * pad - P) // P) + 1
    if (L_out - 1) * P >= L + pad:
        L_out -= 1
    total = L_out * P
    buf = jnp.full((B, C, total), -jnp.inf, y.dtype)
    n_copy = min(L, total - pad)
    buf = jax.lax.dynamic_update_slice(buf, y[:, :, :n_copy], (0, 0, pad))
    return buf.reshape(B, C, L_out, P).max(axis=-1)


if __name__ == "__main__":
    key = jax.random.PRNGKey(0)
    kx, kw, kg, kb, km, kv = jax.random.split(key, 6)

    B, C_in, L = 2, 4, 16
    C_out, K = 32, 5

    x = jax.random.normal(kx, (B, C_in, L), jnp.float32)
    w = 0.1 * jax.random.normal(kw, (C_out, C_in, K), jnp.float32)
    gamma = 1.0 + 0.1 * jax.random.normal(kg, (C_out,), jnp.float32)
    beta = 0.1 * jax.random.normal(kb, (C_out,), jnp.float32)
    running_mean = 0.1 * jax.random.normal(km, (C_out,), jnp.float32)
    running_var = 0.5 + jax.random.uniform(kv, (C_out,), jnp.float32)

    # Pooled path (pool_size=2, as in the scBasset conv tower).
    out = conv_block_forward(x, w, gamma, beta, running_mean, running_var,
                             pool_size=2)
    out = jax.block_until_ready(out)
    ref = _ref_conv_block(x, w, gamma, beta, running_mean, running_var,
                          pool_size=2)
    assert out.shape == ref.shape and out.dtype == ref.dtype
    assert jnp.allclose(out, ref, atol=2e-2, rtol=2e-2), (
        float(jnp.max(jnp.abs(out - ref))))

    # Odd pool size (pool_size=3) -> exercises the ceil_mode / -inf mask path.
    out3 = conv_block_forward(x, w, gamma, beta, running_mean, running_var,
                              pool_size=3)
    out3 = jax.block_until_ready(out3)
    ref3 = _ref_conv_block(x, w, gamma, beta, running_mean, running_var,
                           pool_size=3)
    assert out3.shape == ref3.shape
    assert jnp.allclose(out3, ref3, atol=2e-2, rtol=2e-2), (
        float(jnp.max(jnp.abs(out3 - ref3))))

    # pool_size=None path (nn.Identity pooling).
    out_np = conv_block_forward(x, w, gamma, beta, running_mean, running_var,
                                pool_size=None)
    out_np = jax.block_until_ready(out_np)
    ref_np = _ref_conv_block(x, w, gamma, beta, running_mean, running_var,
                             pool_size=None)
    assert out_np.shape == ref_np.shape
    assert jnp.allclose(out_np, ref_np, atol=2e-2, rtol=2e-2), (
        float(jnp.max(jnp.abs(out_np - ref_np))))

    print("KERNEL_OK")
</pallas_src>

<mosaic_0001>
module attributes {stable_mosaic.version = 11 : i64} {
  func.func @_conv_block_kernel(%arg0: i32, %arg1: memref<2x2x10x8xf32, #tpu.memory_space<vmem>>, %arg2: memref<5x8x128xbf16, #tpu.memory_space<vmem>>, %arg3: memref<1x128xf32, #tpu.memory_space<vmem>>, %arg4: memref<1x128xf32, #tpu.memory_space<vmem>>, %arg5: memref<2x8x128xf32, #tpu.memory_space<vmem>>, %arg6: memref<2x2x10x8xbf16, #tpu.memory_space<vmem>>) attributes {dimension_semantics = [#tpu.dimension_semantics<parallel>], iteration_bounds = array<i64: 1>, scalar_prefetch = 0 : i64, scratch_operands = 1 : i64, tpu.core_type = #tpu.core_type<tc>, window_params = [{transform_indices = @transform_0, window_bounds = array<i64: 2, 2, 10, 8>}, {pipeline_mode = #tpu.pipeline_mode<synchronous>, transform_indices = @transform_1, window_bounds = array<i64: 5, 8, 128>}, {pipeline_mode = #tpu.pipeline_mode<synchronous>, transform_indices = @transform_2, window_bounds = array<i64: 1, 128>}, {pipeline_mode = #tpu.pipeline_mode<synchronous>, transform_indices = @transform_3, window_bounds = array<i64: 1, 128>}, {transform_indices = @transform_4, window_bounds = array<i64: 2, 8, 128>}]} {
    %c0 = arith.constant 0 : index
    %c0_0 = arith.constant 0 : index
    %c0_1 = arith.constant 0 : index
    %c0_2 = arith.constant 0 : index
    %0 = vector.load %arg1[%c0, %c0_0, %c0_1, %c0_2] : memref<2x2x10x8xf32, #tpu.memory_space<vmem>>, vector<2x2x10x8xf32>
    %cst = arith.constant -1.702000e+00 : f32
    %1 = vector.broadcast %cst : f32 to vector<2x2x10x8xf32>
    %2 = arith.mulf %1, %0 : vector<2x2x10x8xf32>
    %3 = math.exp %2 : vector<2x2x10x8xf32>
    %cst_3 = arith.constant 1.000000e+00 : f32
    %4 = vector.broadcast %cst_3 : f32 to vector<2x2x10x8xf32>
    %5 = arith.addf %4, %3 : vector<2x2x10x8xf32>
    %6 = tpu.reciprocal %5 {approx = true} : vector<2x2x10x8xf32> -> vector<2x2x10x8xf32>
    %7 = arith.mulf %0, %6 : vector<2x2x10x8xf32>
    %8 = arith.truncf %7 : vector<2x2x10x8xf32> to vector<2x2x10x8xbf16>
    %c0_4 = arith.constant 0 : index
    %c0_5 = arith.constant 0 : index
    %c0_6 = arith.constant 0 : index
    %c0_7 = arith.constant 0 : index
    %9 = vector.load %arg6[%c0_4, %c0_5, %c0_6, %c0_7] : memref<2x2x10x8xbf16, #tpu.memory_space<vmem>>, vector<2x2x10x8xbf16>
    tpu.vector_store %arg6[%c0_4, %c0_5, %c0_6, %c0_7], %8 {strides = array<i32>} : memref<2x2x10x8xbf16, #tpu.memory_space<vmem>>, vector<2x2x10x8xbf16>,
    %c0_8 = arith.constant 0 : index
    %c0_9 = arith.constant 0 : index
    %10 = vector.load %arg3[%c0_8, %c0_9] : memref<1x128xf32, #tpu.memory_space<vmem>>, vector<1x128xf32>
    %c0_10 = arith.constant 0 : index
    %c0_11 = arith.constant 0 : index
    %11 = vector.load %arg4[%c0_10, %c0_11] : memref<1x128xf32, #tpu.memory_space<vmem>>, vector<1x128xf32>
    %cst_12 = arith.constant 0.000000e+00 : f32
    %12 = vector.broadcast %cst_12 : f32 to vector<8x128xf32>
    %c0_13 = arith.constant 0 : index
    %c0_14 = arith.constant 0 : index
    %c0_15 = arith.constant 0 : index
    %c0_16 = arith.constant 0 : index
    %13 = vector.load %arg6[%c0_13, %c0_14, %c0_15, %c0_16] : memref<2x2x10x8xbf16, #tpu.memory_space<vmem>>, vector<1x1x8x8xbf16>
    %14 = vector.shape_cast %13 : vector<1x1x8x8xbf16> to vector<8x8xbf16>
    %c0_17 = arith.constant 0 : index
    %c0_18 = arith.constant 0 : index
    %c0_19 = arith.constant 0 : index
    %15 = vector.load %arg2[%c0_17, %c0_18, %c0_19] : memref<5x8x128xbf16, #tpu.memory_space<vmem>>, vector<1x8x128xbf16>
    %16 = vector.shape_cast %15 : vector<1x8x128xbf16> to vector<8x128xbf16>
    %cst_20 = arith.constant dense<0.000000e+00> : vector<8x128xf32>
    %17 = tpu.matmul %14, %16, %cst_20 {dimension_numbers = #tpu.dot_dimension_numbers<[1], [0], [0], [1], [0, 0, 1, 1], [], []>} : vector<8x8xbf16>, vector<8x128xbf16>, vector<8x128xf32> -> vector<8x128xf32>
    %18 = arith.addf %12, %17 : vector<8x128xf32>
    %c0_21 = arith.constant 0 : index
    %c1 = arith.constant 1 : index
    %c0_22 = arith.constant 0 : index
    %c0_23 = arith.constant 0 : index
    %19 = vector.load %arg6[%c0_21, %c1, %c0_22, %c0_23] : memref<2x2x10x8xbf16, #tpu.memory_space<vmem>>, vector<1x1x8x8xbf16>
    %20 = vector.shape_cast %19 : vector<1x1x8x8xbf16> to vector<8x8xbf16>
    %c1_24 = arith.constant 1 : index
    %c0_25 = arith.constant 0 : index
    %c0_26 = arith.constant 0 : index
    %21 = vector.load %arg2[%c1_24, %c0_25, %c0_26] : memref<5x8x128xbf16, #tpu.memory_space<vmem>>, vector<1x8x128xbf16>
    %22 = vector.shape_cast %21 : vector<1x8x128xbf16> to vector<8x128xbf16>
    %cst_27 = arith.constant dense<0.000000e+00> : vector<8x128xf32>
    %23 = tpu.matmul %20, %22, %cst_27 {dimension_numbers = #tpu.dot_dimension_numbers<[1], [0], [0], [1], [0, 0, 1, 1], [], []>} : vector<8x8xbf16>, vector<8x128xbf16>, vector<8x128xf32> -> vector<8x128xf32>
    %24 = arith.addf %18, %23 : vector<8x128xf32>
    %c0_28 = arith.constant 0 : index
    %c0_29 = arith.constant 0 : index
    %c1_30 = arith.constant 1 : index
    %c0_31 = arith.constant 0 : index
    %25 = vector.load %arg6[%c0_28, %c0_29, %c1_30, %c0_31] : memref<2x2x10x8xbf16, #tpu.memory_space<vmem>>, vector<1x1x8x8xbf16>
    %26 = vector.shape_cast %25 : vector<1x1x8x8xbf16> to vector<8x8xbf16>
    %c2 = arith.constant 2 : index
    %c0_32 = arith.constant 0 : index
    %c0_33 = arith.constant 0 : index
    %27 = vector.load %arg2[%c2, %c0_32, %c0_33] : memref<5x8x128xbf16, #tpu.memory_space<vmem>>, vector<1x8x128xbf16>
    %28 = vector.shape_cast %27 : vector<1x8x128xbf16> to vector<8x128xbf16>
    %cst_34 = arith.constant dense<0.000000e+00> : vector<8x128xf32>
    %29 = tpu.matmul %26, %28, %cst_34 {dimension_numbers = #tpu.dot_dimension_numbers<[1], [0], [0], [1], [0, 0, 1, 1], [], []>} : vector<8x8xbf16>, vector<8x128xbf16>, vector<8x128xf32> -> vector<8x128xf32>
    %30 = arith.addf %24, %29 : vector<8x128xf32>
    %c0_35 = arith.constant 0 : index
    %c1_36 = arith.constant 1 : index
    %c1_37 = arith.constant 1 : index
    %c0_38 = arith.constant 0 : index
    %31 = vector.load %arg6[%c0_35, %c1_36, %c1_37, %c0_38] : memref<2x2x10x8xbf16, #tpu.memory_space<vmem>>, vector<1x1x8x8xbf16>
    %32 = vector.shape_cast %31 : vector<1x1x8x8xbf16> to vector<8x8xbf16>
    %c3 = arith.constant 3 : index
    %c0_39 = arith.constant 0 : index
    %c0_40 = arith.constant 0 : index
    %33 = vector.load %arg2[%c3, %c0_39, %c0_40] : memref<5x8x128xbf16, #tpu.memory_space<vmem>>, vector<1x8x128xbf16>
    %34 = vector.shape_cast %33 : vector<1x8x128xbf16> to vector<8x128xbf16>
    %cst_41 = arith.constant dense<0.000000e+00> : vector<8x128xf32>
    %35 = tpu.matmul %32, %34, %cst_41 {dimension_numbers = #tpu.dot_dimension_numbers<[1], [0], [0], [1], [0, 0, 1, 1], [], []>} : vector<8x8xbf16>, vector<8x128xbf16>, vector<8x128xf32> -> vector<8x128xf32>
    %36 = arith.addf %30, %35 : vector<8x128xf32>
    %c0_42 = arith.constant 0 : index
    %c0_43 = arith.constant 0 : index
    %c2_44 = arith.constant 2 : index
    %c0_45 = arith.constant 0 : index
    %37 = vector.load %arg6[%c0_42, %c0_43, %c2_44, %c0_45] : memref<2x2x10x8xbf16, #tpu.memory_space<vmem>>, vector<1x1x8x8xbf16>
    %38 = vector.shape_cast %37 : vector<1x1x8x8xbf16> to vector<8x8xbf16>
    %c4 = arith.constant 4 : index
    %c0_46 = arith.constant 0 : index
    %c0_47 = arith.constant 0 : index
    %39 = vector.load %arg2[%c4, %c0_46, %c0_47] : memref<5x8x128xbf16, #tpu.memory_space<vmem>>, vector<1x8x128xbf16>
    %40 = vector.shape_cast %39 : vector<1x8x128xbf16> to vector<8x128xbf16>
    %cst_48 = arith.constant dense<0.000000e+00> : vector<8x128xf32>
    %41 = tpu.matmul %38, %40, %cst_48 {dimension_numbers = #tpu.dot_dimension_numbers<[1], [0], [0], [1], [0, 0, 1, 1], [], []>} : vector<8x8xbf16>, vector<8x128xbf16>, vector<8x128xf32> -> vector<8x128xf32>
    %42 = arith.addf %36, %41 : vector<8x128xf32>
    %43 = vector.broadcast %10 : vector<1x128xf32> to vector<8x128xf32>
    %44 = arith.mulf %42, %43 : vector<8x128xf32>
    %45 = vector.broadcast %11 : vector<1x128xf32> to vector<8x128xf32>
    %46 = arith.addf %44, %45 : vector<8x128xf32>
    %cst_49 = arith.constant 0.000000e+00 : f32
    %47 = vector.broadcast %cst_49 : f32 to vector<8x128xf32>
    %c0_50 = arith.constant 0 : index
    %c1_51 = arith.constant 1 : index
    %c0_52 = arith.constant 0 : index
    %c0_53 = arith.constant 0 : index
    %48 = vector.load %arg6[%c0_50, %c1_51, %c0_52, %c0_53] : memref<2x2x10x8xbf16, #tpu.memory_space<vmem>>, vector<1x1x8x8xbf16>
    %49 = vector.shape_cast %48 : vector<1x1x8x8xbf16> to vector<8x8xbf16>
    %c0_54 = arith.constant 0 : index
    %c0_55 = arith.constant 0 : index
    %c0_56 = arith.constant 0 : index
    %50 = vector.load %arg2[%c0_54, %c0_55, %c0_56] : memref<5x8x128xbf16, #tpu.memory_space<vmem>>, vector<1x8x128xbf16>
    %51 = vector.shape_cast %50 : vector<1x8x128xbf16> to vector<8x128xbf16>
    %cst_57 = arith.constant dense<0.000000e+00> : vector<8x128xf32>
    %52 = tpu.matmul %49, %51, %cst_57 {dimension_numbers = #tpu.dot_dimension_numbers<[1], [0], [0], [1], [0, 0, 1, 1], [], []>} : vector<8x8xbf16>, vector<8x128xbf16>, vector<8x128xf32> -> vector<8x128xf32>
    %53 = arith.addf %47, %52 : vector<8x128xf32>
    %c0_58 = arith.constant 0 : index
    %c0_59 = arith.constant 0 : index
    %c1_60 = arith.constant 1 : index
    %c0_61 = arith.constant 0 : index
    %54 = vector.load %arg6[%c0_58, %c0_59, %c1_60, %c0_61] : memref<2x2x10x8xbf16, #tpu.memory_space<vmem>>, vector<1x1x8x8xbf16>
    %55 = vector.shape_cast %54 : vector<1x1x8x8xbf16> to vector<8x8xbf16>
    %c1_62 = arith.constant 1 : index
    %c0_63 = arith.constant 0 : index
    %c0_64 = arith.constant 0 : index
    %56 = vector.load %arg2[%c1_62, %c0_63, %c0_64] : memref<5x8x128xbf16, #tpu.memory_space<vmem>>, vector<1x8x128xbf16>
    %57 = vector.shape_cast %56 : vector<1x8x128xbf16> to vector<8x128xbf16>
    %cst_65 = arith.constant dense<0.000000e+00> : vector<8x128xf32>
    %58 = tpu.matmul %55, %57, %cst_65 {dimension_numbers = #tpu.dot_dimension_numbers<[1], [0], [0], [1], [0, 0, 1, 1], [], []>} : vector<8x8xbf16>, vector<8x128xbf16>, vector<8x128xf32> -> vector<8x128xf32>
    %59 = arith.addf %53, %58 : vector<8x128xf32>
    %c0_66 = arith.constant 0 : index
    %c1_67 = arith.constant 1 : index
    %c1_68 = arith.constant 1 : index
    %c0_69 = arith.constant 0 : index
    %60 = vector.load %arg6[%c0_66, %c1_67, %c1_68, %c0_69] : memref<2x2x10x8xbf16, #tpu.memory_space<vmem>>, vector<1x1x8x8xbf16>
    %61 = vector.shape_cast %60 : vector<1x1x8x8xbf16> to vector<8x8xbf16>
    %c2_70 = arith.constant 2 : index
    %c0_71 = arith.constant 0 : index
    %c0_72 = arith.constant 0 : index
    %62 = vector.load %arg2[%c2_70, %c0_71, %c0_72] : memref<5x8x128xbf16, #tpu.memory_space<vmem>>, vector<1x8x128xbf16>
    %63 = vector.shape_cast %62 : vector<1x8x128xbf16> to vector<8x128xbf16>
    %cst_73 = arith.constant dense<0.000000e+00> : vector<8x128xf32>
    %64 = tpu.matmul %61, %63, %cst_73 {dimension_numbers = #tpu.dot_dimension_numbers<[1], [0], [0], [1], [0, 0, 1, 1], [], []>} : vector<8x8xbf16>, vector<8x128xbf16>, vector<8x128xf32> -> vector<8x128xf32>
    %65 = arith.addf %59, %64 : vector<8x128xf32>
    %c0_74 = arith.constant 0 : index
    %c0_75 = arith.constant 0 : index
    %c2_76 = arith.constant 2 : index
    %c0_77 = arith.constant 0 : index
    %66 = vector.load %arg6[%c0_74, %c0_75, %c2_76, %c0_77] : memref<2x2x10x8xbf16, #tpu.memory_space<vmem>>, vector<1x1x8x8xbf16>
    %67 = vector.shape_cast %66 : vector<1x1x8x8xbf16> to vector<8x8xbf16>
    %c3_78 = arith.constant 3 : index
    %c0_79 = arith.constant 0 : index
    %c0_80 = arith.constant 0 : index
    %68 = vector.load %arg2[%c3_78, %c0_79, %c0_80] : memref<5x8x128xbf16, #tpu.memory_space<vmem>>, vector<1x8x128xbf16>
    %69 = vector.shape_cast %68 : vector<1x8x128xbf16> to vector<8x128xbf16>
    %cst_81 = arith.constant dense<0.000000e+00> : vector<8x128xf32>
    %70 = tpu.matmul %67, %69, %cst_81 {dimension_numbers = #tpu.dot_dimension_numbers<[1], [0], [0], [1], [0, 0, 1, 1], [], []>} : vector<8x8xbf16>, vector<8x128xbf16>, vector<8x128xf32> -> vector<8x128xf32>
    %71 = arith.addf %65, %70 : vector<8x128xf32>
    %c0_82 = arith.constant 0 : index
    %c1_83 = arith.constant 1 : index
    %c2_84 = arith.constant 2 : index
    %c0_85 = arith.constant 0 : index
    %72 = vector.load %arg6[%c0_82, %c1_83, %c2_84, %c0_85] : memref<2x2x10x8xbf16, #tpu.memory_space<vmem>>, vector<1x1x8x8xbf16>
    %73 = vector.shape_cast %72 : vector<1x1x8x8xbf16> to vector<8x8xbf16>
    %c4_86 = arith.constant 4 : index
    %c0_87 = arith.constant 0 : index
    %c0_88 = arith.constant 0 : index
    %74 = vector.load %arg2[%c4_86, %c0_87, %c0_88] : memref<5x8x128xbf16, #tpu.memory_space<vmem>>, vector<1x8x128xbf16>
    %75 = vector.shape_cast %74 : vector<1x8x128xbf16> to vector<8x128xbf16>
    %cst_89 = arith.constant dense<0.000000e+00> : vector<8x128xf32>
    %76 = tpu.matmul %73, %75, %cst_89 {dimension_numbers = #tpu.dot_dimension_numbers<[1], [0], [0], [1], [0, 0, 1, 1], [], []>} : vector<8x8xbf16>, vector<8x128xbf16>, vector<8x128xf32> -> vector<8x128xf32>
    %77 = arith.addf %71, %76 : vector<8x128xf32>
    %78 = vector.broadcast %10 : vector<1x128xf32> to vector<8x128xf32>
    %79 = arith.mulf %77, %78 : vector<8x128xf32>
    %80 = vector.broadcast %11 : vector<1x128xf32> to vector<8x128xf32>
    %81 = arith.addf %79, %80 : vector<8x128xf32>
    %82 = arith.maximumf %46, %81 : vector<8x128xf32>
    %c0_90 = arith.constant 0 : index
    %c0_91 = arith.constant 0 : index
    %c0_92 = arith.constant 0 : index
    %83 = vector.load %arg5[%c0_90, %c0_91, %c0_92] : memref<2x8x128xf32, #tpu.memory_space<vmem>>, vector<1x8x128xf32>
    %84 = vector.shape_cast %83 : vector<1x8x128xf32> to vector<8x128xf32>
    %85 = vector.shape_cast %82 : vector<8x128xf32> to vector<1x8x128xf32>
    tpu.vector_store %arg5[%c0_90, %c0_91, %c0_92], %85 {strides = array<i32>} : memref<2x8x128xf32, #tpu.memory_space<vmem>>, vector<1x8x128xf32>,
    %cst_93 = arith.constant 0.000000e+00 : f32
    %86 = vector.broadcast %cst_93 : f32 to vector<8x128xf32>
    %c1_94 = arith.constant 1 : index
    %c0_95 = arith.constant 0 : index
    %c0_96 = arith.constant 0 : index
    %c0_97 = arith.constant 0 : index
    %87 = vector.load %arg6[%c1_94, %c0_95, %c0_96, %c0_97] : memref<2x2x10x8xbf16, #tpu.memory_space<vmem>>, vector<1x1x8x8xbf16>
    %88 = vector.shape_cast %87 : vector<1x1x8x8xbf16> to vector<8x8xbf16>
    %c0_98 = arith.constant 0 : index
    %c0_99 = arith.constant 0 : index
    %c0_100 = arith.constant 0 : index
    %89 = vector.load %arg2[%c0_98, %c0_99, %c0_100] : memref<5x8x128xbf16, #tpu.memory_space<vmem>>, vector<1x8x128xbf16>
    %90 = vector.shape_cast %89 : vector<1x8x128xbf16> to vector<8x128xbf16>
    %cst_101 = arith.constant dense<0.000000e+00> : vector<8x128xf32>
    %91 = tpu.matmul %88, %90, %cst_101 {dimension_numbers = #tpu.dot_dimension_numbers<[1], [0], [0], [1], [0, 0, 1, 1], [], []>} : vector<8x8xbf16>, vector<8x128xbf16>, vector<8x128xf32> -> vector<8x128xf32>
    %92 = arith.addf %86, %91 : vector<8x128xf32>
    %c1_102 = arith.constant 1 : index
    %c1_103 = arith.constant 1 : index
    %c0_104 = arith.constant 0 : index
    %c0_105 = arith.constant 0 : index
    %93 = vector.load %arg6[%c1_102, %c1_103, %c0_104, %c0_105] : memref<2x2x10x8xbf16, #tpu.memory_space<vmem>>, vector<1x1x8x8xbf16>
    %94 = vector.shape_cast %93 : vector<1x1x8x8xbf16> to vector<8x8xbf16>
    %c1_106 = arith.constant 1 : index
    %c0_107 = arith.constant 0 : index
    %c0_108 = arith.constant 0 : index
    %95 = vector.load %arg2[%c1_106, %c0_107, %c0_108] : memref<5x8x128xbf16, #tpu.memory_space<vmem>>, vector<1x8x128xbf16>
    %96 = vector.shape_cast %95 : vector<1x8x128xbf16> to vector<8x128xbf16>
    %cst_109 = arith.constant dense<0.000000e+00> : vector<8x128xf32>
    %97 = tpu.matmul %94, %96, %cst_109 {dimension_numbers = #tpu.dot_dimension_numbers<[1], [0], [0], [1], [0, 0, 1, 1], [], []>} : vector<8x8xbf16>, vector<8x128xbf16>, vector<8x128xf32> -> vector<8x128xf32>
    %98 = arith.addf %92, %97 : vector<8x128xf32>
    %c1_110 = arith.constant 1 : index
    %c0_111 = arith.constant 0 : index
    %c1_112 = arith.constant 1 : index
    %c0_113 = arith.constant 0 : index
    %99 = vector.load %arg6[%c1_110, %c0_111, %c1_112, %c0_113] : memref<2x2x10x8xbf16, #tpu.memory_space<vmem>>, vector<1x1x8x8xbf16>
    %100 = vector.shape_cast %99 : vector<1x1x8x8xbf16> to vector<8x8xbf16>
    %c2_114 = arith.constant 2 : index
    %c0_115 = arith.constant 0 : index
    %c0_116 = arith.constant 0 : index
    %101 = vector.load %arg2[%c2_114, %c0_115, %c0_116] : memref<5x8x128xbf16, #tpu.memory_space<vmem>>, vector<1x8x128xbf16>
    %102 = vector.shape_cast %101 : vector<1x8x128xbf16> to vector<8x128xbf16>
    %cst_117 = arith.constant dense<0.000000e+00> : vector<8x128xf32>
    %103 = tpu.matmul %100, %102, %cst_117 {dimension_numbers = #tpu.dot_dimension_numbers<[1], [0], [0], [1], [0, 0, 1, 1], [], []>} : vector<8x8xbf16>, vector<8x128xbf16>, vector<8x128xf32> -> vector<8x128xf32>
    %104 = arith.addf %98, %103 : vector<8x128xf32>
    %c1_118 = arith.constant 1 : index
    %c1_119 = arith.constant 1 : index
    %c1_120 = arith.constant 1 : index
    %c0_121 = arith.constant 0 : index
    %105 = vector.load %arg6[%c1_118, %c1_119, %c1_120, %c0_121] : memref<2x2x10x8xbf16, #tpu.memory_space<vmem>>, vector<1x1x8x8xbf16>
    %106 = vector.shape_cast %105 : vector<1x1x8x8xbf16> to vector<8x8xbf16>
    %c3_122 = arith.constant 3 : index
    %c0_123 = arith.constant 0 : index
    %c0_124 = arith.constant 0 : index
    %107 = vector.load %arg2[%c3_122, %c0_123, %c0_124] : memref<5x8x128xbf16, #tpu.memory_space<vmem>>, vector<1x8x128xbf16>
    %108 = vector.shape_cast %107 : vector<1x8x128xbf16> to vector<8x128xbf16>
    %cst_125 = arith.constant dense<0.000000e+00> : vector<8x128xf32>
    %109 = tpu.matmul %106, %108, %cst_125 {dimension_numbers = #tpu.dot_dimension_numbers<[1], [0], [0], [1], [0, 0, 1, 1], [], []>} : vector<8x8xbf16>, vector<8x128xbf16>, vector<8x128xf32> -> vector<8x128xf32>
    %110 = arith.addf %104, %109 : vector<8x128xf32>
    %c1_126 = arith.constant 1 : index
    %c0_127 = arith.constant 0 : index
    %c2_128 = arith.constant 2 : index
    %c0_129 = arith.constant 0 : index
    %111 = vector.load %arg6[%c1_126, %c0_127, %c2_128, %c0_129] : memref<2x2x10x8xbf16, #tpu.memory_space<vmem>>, vector<1x1x8x8xbf16>
    %112 = vector.shape_cast %111 : vector<1x1x8x8xbf16> to vector<8x8xbf16>
    %c4_130 = arith.constant 4 : index
    %c0_131 = arith.constant 0 : index
    %c0_132 = arith.constant 0 : index
    %113 = vector.load %arg2[%c4_130, %c0_131, %c0_132] : memref<5x8x128xbf16, #tpu.memory_space<vmem>>, vector<1x8x128xbf16>
    %114 = vector.shape_cast %113 : vector<1x8x128xbf16> to vector<8x128xbf16>
    %cst_133 = arith.constant dense<0.000000e+00> : vector<8x128xf32>
    %115 = tpu.matmul %112, %114, %cst_133 {dimension_numbers = #tpu.dot_dimension_numbers<[1], [0], [0], [1], [0, 0, 1, 1], [], []>} : vector<8x8xbf16>, vector<8x128xbf16>, vector<8x128xf32> -> vector<8x128xf32>
    %116 = arith.addf %110, %115 : vector<8x128xf32>
    %117 = vector.broadcast %10 : vector<1x128xf32> to vector<8x128xf32>
    %118 = arith.mulf %116, %117 : vector<8x128xf32>
    %119 = vector.broadcast %11 : vector<1x128xf32> to vector<8x128xf32>
    %120 = arith.addf %118, %119 : vector<8x128xf32>
    %cst_134 = arith.constant 0.000000e+00 : f32
    %121 = vector.broadcast %cst_134 : f32 to vector<8x128xf32>
    %c1_135 = arith.constant 1 : index
    %c1_136 = arith.constant 1 : index
    %c0_137 = arith.constant 0 : index
    %c0_138 = arith.constant 0 : index
    %122 = vector.load %arg6[%c1_135, %c1_136, %c0_137, %c0_138] : memref<2x2x10x8xbf16, #tpu.memory_space<vmem>>, vector<1x1x8x8xbf16>
    %123 = vector.shape_cast %122 : vector<1x1x8x8xbf16> to vector<8x8xbf16>
    %c0_139 = arith.constant 0 : index
    %c0_140 = arith.constant 0 : index
    %c0_141 = arith.constant 0 : index
    %124 = vector.load %arg2[%c0_139, %c0_140, %c0_141] : memref<5x8x128xbf16, #tpu.memory_space<vmem>>, vector<1x8x128xbf16>
    %125 = vector.shape_cast %124 : vector<1x8x128xbf16> to vector<8x128xbf16>
    %cst_142 = arith.constant dense<0.000000e+00> : vector<8x128xf32>
    %126 = tpu.matmul %123, %125, %cst_142 {dimension_numbers = #tpu.dot_dimension_numbers<[1], [0], [0], [1], [0, 0, 1, 1], [], []>} : vector<8x8xbf16>, vector<8x128xbf16>, vector<8x128xf32> -> vector<8x128xf32>
    %127 = arith.addf %121, %126 : vector<8x128xf32>
    %c1_143 = arith.constant 1 : index
    %c0_144 = arith.constant 0 : index
    %c1_145 = arith.constant 1 : index
    %c0_146 = arith.constant 0 : index
    %128 = vector.load %arg6[%c1_143, %c0_144, %c1_145, %c0_146] : memref<2x2x10x8xbf16, #tpu.memory_space<vmem>>, vector<1x1x8x8xbf16>
    %129 = vector.shape_cast %128 : vector<1x1x8x8xbf16> to vector<8x8xbf16>
    %c1_147 = arith.constant 1 : index
    %c0_148 = arith.constant 0 : index
    %c0_149 = arith.constant 0 : index
    %130 = vector.load %arg2[%c1_147, %c0_148, %c0_149] : memref<5x8x128xbf16, #tpu.memory_space<vmem>>, vector<1x8x128xbf16>
    %131 = vector.shape_cast %130 : vector<1x8x128xbf16> to vector<8x128xbf16>
    %cst_150 = arith.constant dense<0.000000e+00> : vector<8x128xf32>
    %132 = tpu.matmul %129, %131, %cst_150 {dimension_numbers = #tpu.dot_dimension_numbers<[1], [0], [0], [1], [0, 0, 1, 1], [], []>} : vector<8x8xbf16>, vector<8x128xbf16>, vector<8x128xf32> -> vector<8x128xf32>
    %133 = arith.addf %127, %132 : vector<8x128xf32>
    %c1_151 = arith.constant 1 : index
    %c1_152 = arith.constant 1 : index
    %c1_153 = arith.constant 1 : index
    %c0_154 = arith.constant 0 : index
    %134 = vector.load %arg6[%c1_151, %c1_152, %c1_153, %c0_154] : memref<2x2x10x8xbf16, #tpu.memory_space<vmem>>, vector<1x1x8x8xbf16>
    %135 = vector.shape_cast %134 : vector<1x1x8x8xbf16> to vector<8x8xbf16>
    %c2_155 = arith.constant 2 : index
    %c0_156 = arith.constant 0 : index
    %c0_157 = arith.constant 0 : index
    %136 = vector.load %arg2[%c2_155, %c0_156, %c0_157] : memref<5x8x128xbf16, #tpu.memory_space<vmem>>, vector<1x8x128xbf16>
    %137 = vector.shape_cast %136 : vector<1x8x128xbf16> to vector<8x128xbf16>
    %cst_158 = arith.constant dense<0.000000e+00> : vector<8x128xf32>
    %138 = tpu.matmul %135, %137, %cst_158 {dimension_numbers = #tpu.dot_dimension_numbers<[1], [0], [0], [1], [0, 0, 1, 1], [], []>} : vector<8x8xbf16>, vector<8x128xbf16>, vector<8x128xf32> -> vector<8x128xf32>
    %139 = arith.addf %133, %138 : vector<8x128xf32>
    %c1_159 = arith.constant 1 : index
    %c0_160 = arith.constant 0 : index
    %c2_161 = arith.constant 2 : index
    %c0_162 = arith.constant 0 : index
    %140 = vector.load %arg6[%c1_159, %c0_160, %c2_161, %c0_162] : memref<2x2x10x8xbf16, #tpu.memory_space<vmem>>, vector<1x1x8x8xbf16>
    %141 = vector.shape_cast %140 : vector<1x1x8x8xbf16> to vector<8x8xbf16>
    %c3_163 = arith.constant 3 : index
    %c0_164 = arith.constant 0 : index
    %c0_165 = arith.constant 0 : index
    %142 = vector.load %arg2[%c3_163, %c0_164, %c0_165] : memref<5x8x128xbf16, #tpu.memory_space<vmem>>, vector<1x8x128xbf16>
    %143 = vector.shape_cast %142 : vector<1x8x128xbf16> to vector<8x128xbf16>
    %cst_166 = arith.constant dense<0.000000e+00> : vector<8x128xf32>
    %144 = tpu.matmul %141, %143, %cst_166 {dimension_numbers = #tpu.dot_dimension_numbers<[1], [0], [0], [1], [0, 0, 1, 1], [], []>} : vector<8x8xbf16>, vector<8x128xbf16>, vector<8x128xf32> -> vector<8x128xf32>
    %145 = arith.addf %139, %144 : vector<8x128xf32>
    %c1_167 = arith.constant 1 : index
    %c1_168 = arith.constant 1 : index
    %c2_169 = arith.constant 2 : index
    %c0_170 = arith.constant 0 : index
    %146 = vector.load %arg6[%c1_167, %c1_168, %c2_169, %c0_170] : memref<2x2x10x8xbf16, #tpu.memory_space<vmem>>, vector<1x1x8x8xbf16>
    %147 = vector.shape_cast %146 : vector<1x1x8x8xbf16> to vector<8x8xbf16>
    %c4_171 = arith.constant 4 : index
    %c0_172 = arith.constant 0 : index
    %c0_173 = arith.constant 0 : index
    %148 = vector.load %arg2[%c4_171, %c0_172, %c0_173] : memref<5x8x128xbf16, #tpu.memory_space<vmem>>, vector<1x8x128xbf16>
    %149 = vector.shape_cast %148 : vector<1x8x128xbf16> to vector<8x128xbf16>
    %cst_174 = arith.constant dense<0.000000e+00> : vector<8x128xf32>
    %150 = tpu.matmul %147, %149, %cst_174 {dimension_numbers = #tpu.dot_dimension_numbers<[1], [0], [0], [1], [0, 0, 1, 1], [], []>} : vector<8x8xbf16>, vector<8x128xbf16>, vector<8x128xf32> -> vector<8x128xf32>
    %151 = arith.addf %145, %150 : vector<8x128xf32>
    %152 = vector.broadcast %10 : vector<1x128xf32> to vector<8x128xf32>
    %153 = arith.mulf %151, %152 : vector<8x128xf32>
    %154 = vector.broadcast %11 : vector<1x128xf32> to vector<8x128xf32>
    %155 = arith.addf %153, %154 : vector<8x128xf32>
    %156 = arith.maximumf %120, %155 : vector<8x128xf32>
    %c1_175 = arith.constant 1 : index
    %c0_176 = arith.constant 0 : index
    %c0_177 = arith.constant 0 : index
    %157 = vector.load %arg5[%c1_175, %c0_176, %c0_177] : memref<2x8x128xf32, #tpu.memory_space<vmem>>, vector<1x8x128xf32>
    %158 = vector.shape_cast %157 : vector<1x8x128xf32> to vector<8x128xf32>
    %159 = vector.shape_cast %156 : vector<8x128xf32> to vector<1x8x128xf32>
    tpu.vector_store %arg5[%c1_175, %c0_176, %c0_177], %159 {strides = array<i32>} : memref<2x8x128xf32, #tpu.memory_space<vmem>>, vector<1x8x128xf32>,
    return
  }
  func.func @transform_0(%arg0: i32) -> (i32, i32, i32, i32) {
    %c0_i32 = arith.constant 0 : i32
    %c0_i32_0 = arith.constant 0 : i32
    %c0_i32_1 = arith.constant 0 : i32
    %c0_i32_2 = arith.constant 0 : i32
    return %arg0, %c0_i32, %c0_i32_0, %c0_i32_1 : i32, i32, i32, i32
  }
  func.func @transform_1(%arg0: i32) -> (i32, i32, i32) {
    %c0_i32 = arith.constant 0 : i32
    %c0_i32_0 = arith.constant 0 : i32
    %c0_i32_1 = arith.constant 0 : i32
    %c0_i32_2 = arith.constant 0 : i32
    return %c0_i32, %c0_i32_0, %c0_i32_1 : i32, i32, i32
  }
  func.func @transform_2(%arg0: i32) -> (i32, i32) {
    %c0_i32 = arith.constant 0 : i32
    %c0_i32_0 = arith.constant 0 : i32
    %c0_i32_1 = arith.constant 0 : i32
    return %c0_i32, %c0_i32_0 : i32, i32
  }
  func.func @transform_3(%arg0: i32) -> (i32, i32) {
    %c0_i32 = arith.constant 0 : i32
    %c0_i32_0 = arith.constant 0 : i32
    %c0_i32_1 = arith.constant 0 : i32
    return %c0_i32, %c0_i32_0 : i32, i32
  }
  func.func @transform_4(%arg0: i32) -> (i32, i32, i32) {
    %c0_i32 = arith.constant 0 : i32
    %c0_i32_0 = arith.constant 0 : i32
    %c0_i32_1 = arith.constant 0 : i32
    return %arg0, %c0_i32, %c0_i32_0 : i32, i32, i32
  }
}

</mosaic_0001>

<bundles_post_ra>
// kernel: tpu_custom_call.1
= control target key start
LH: loop header
LB: loop body
LE: loop exit
PB: predicated region body
PF: predicated region fallthrough
CT: control target
= control target key end

     0   :  { %vm105_vm0 = vcmask 1043456   ;;  %s813_s0 = inlined_call_operand.vmem [shape: f32[2,2,10,8], index: 0, kind: input, shape index: {}]   ;;  %s814_s1 = inlined_call_operand.vmem [shape: bf16[5,8,128], index: 1, kind: input, shape index: {}]   ;;  %s815_s2 = inlined_call_operand.vmem [shape: f32[1,128], index: 2, kind: input, shape index: {}]   ;;  %s816_s3 = inlined_call_operand.vmem [shape: f32[1,128], index: 3, kind: input, shape index: {}]   ;;  %s817_s4 = inlined_call_operand.hbm [shape: f32[2,8,128], index: 4, kind: output, shape index: {}]  }
   0x1   :  { %v569_v0 = vld [vmem:[%s814_s1 + $0x4] sm:$0xf]  ;;  %v96_v1 = vld [vmem:[%s814_s1] sm:$0xf]  ;;  %v21_v2 = vld [vmem:[%s813_s0 + $0x10] sm:$0xff] }
   0x2   :  { %v107_v3 = vsel %vm105_vm0, %v569_v0, 0  ;;  %v126_v4 = vsel %vm105_vm0, %v96_v1, 0  ;;  %v29_v5 = vmul.f32 -1.702, %v21_v2  ;;  %v19_v6 = vld [vmem:[%s813_s0] sm:$0xff] }
   0x3   :  { %116 = vmatpush.bf16.msra.mxu0 %v107_v3  ;;  %135 = vmatpush.bf16.msra.mxu1 %v126_v4  ;;  %v27_v7 = vmul.f32 -1.702, %v19_v6  ;;  %v572_v8 = vld [vmem:[%s814_s1 + $0x8] sm:$0xf]  ;;  %v574_v11 = vld [vmem:[%s814_s1 + $0xc] sm:$0xf] }
   0x4   :  { %v39_v9 = vmul.f32 1.442695, %v29_v5  ;;  %v161_v10 = vsel %vm105_vm0, %v572_v8, 0  ;;  %v710_v13 = vsel %vm105_vm0, %v574_v11, 0  ;;  %v20_v14 = vld [vmem:[%s813_s0 + $0x8] sm:$0x3] }
   0x5   :  { %v35_v12 = vmul.f32 1.442695, %v27_v7  ;;  %170 = vmatpush.bf16.msra.mxu2 %v161_v10  ;;  %206 = vmatpush.bf16.msra.mxu3 %v710_v13  ;;  %v28_v15 = vmul.f32 -1.702, %v20_v14  ;;  %v22_v16 = vld [vmem:[%s813_s0 + $0x18] sm:$0x3] }
   0x6   :  { %602 = vpow2.f32 %v39_v9  ;;  %v30_v17 = vmul.f32 -1.702, %v22_v16 }
   0x7   :  { %255 = vmatpush.bf16.msrb.mxu1 %v107_v3  ;;  %604 = vpow2.f32 %v35_v12 }
   0x9   :  { %268 = vmatpush.bf16.msrb.mxu2 %v126_v4  ;;  %281 = vmatpush.bf16.msrb.mxu3 %v161_v10 }
   0xa   :  { %9 = vsyncpa [#allocation4], 0  ;;  %v37_v18 = vmul.f32 1.442695, %v28_v15  ;;  %v41_v19 = vmul.f32 1.442695, %v30_v17 }
   0xb   :  { %v722_v24 = vld [vmem:[%s813_s0 + $0x20] sm:$0xff]  ;;  %v727_v25 = vld [vmem:[%s813_s0 + $0x28] sm:$0x3]  ;;  %v734_v29 = vld [vmem:[%s813_s0 + $0x30] sm:$0xff]  ;;  %vm83_vm1 = vcmask 60416   ;;  %vm85_vm2 = vcmask 57344  }
   0xc   :  { %606 = vpow2.f32 %v37_v18  ;;  %v603_v20 = vpop.eup %602  ;;  %v31_v26 = vmul.f32 -1.702, %v722_v24  ;;  %v32_v27 = vmul.f32 -1.702, %v727_v25  ;;  %v739_v30 = vld [vmem:[%s813_s0 + $0x38] sm:$0x3] }
   0xd   :  { %608 = vpow2.f32 %v41_v19  ;;  %v605_v21 = vpop.eup %604  ;;  %v53_v22 = vadd.f32 1.0, %v603_v20  ;;  %v576_v33 = vld [vmem:[%s814_s1 + $0x10] sm:$0xf]  ;;  %v33_v34 = vmul.f32 -1.702, %v734_v29  ;;  %vm101_vm3 = vcmask 64512  }
   0xe   :  { %v51_v23 = vadd.f32 1.0, %v605_v21  ;;  %v224_v36 = vsel %vm105_vm0, %v576_v33, 0  ;;  %v43_v37 = vmul.f32 1.442695, %v31_v26  ;;  %v45_v39 = vmul.f32 1.442695, %v32_v27 }
   0xf   :  { %610 = vrcp.f32 %v53_v22  ;;  %233 = vmatpush.bf16.msrb.mxu0 %v224_v36  ;;  %v47_v38 = vmul.f32 1.442695, %v33_v34  ;;  %v34_v40 = vmul.f32 -1.702, %v739_v30  ;;  %s557_s29 = sshll.u32 %s817_s4, 4  ;;  %s661_s30 = smov 128   ;;  %s558_s29 = int_to_ptr.hbm [resolvable:$true] %s557_s29 }
  0x10   :  { %612 = vrcp.f32 %v51_v23  ;;  %s662_s5 = smov 8  }
  0x11   :  { %v49_v42 = vmul.f32 1.442695, %v34_v40  ;;  %v588_v40 = vld [vmem:[%s814_s1 + $0xc] sm:$0xf] }
  0x12   :  { %v607_v28 = vpop.eup %606 }
  0x13   :  { %v609_v31 = vpop.eup %608  ;;  %v52_v32 = vadd.f32 1.0, %v607_v28 }
  0x14   :  { %v54_v35 = vadd.f32 1.0, %v609_v31 }
  0x15   :  { %614 = vrcp.f32 %v52_v32  ;;  %v611_v41 = vpop.eup %610 }
  0x16   :  { %616 = vrcp.f32 %v54_v35  ;;  %v613_v43 = vpop.eup %612  ;;  %v69_v44 = vmul.f32 %v611_v41, %v21_v2  ;;  %v426_v41 = vsel %vm105_vm0, %v588_v40, 0 }
  0x17   :  { %618 = vpow2.f32 %v47_v38  ;;  %v67_v45 = vmul.f32 %v613_v43, %v19_v6  ;;  %v586_v38 = vld [vmem:[%s814_s1 + $0x8] sm:$0xf] }
  0x18   :  { %620 = vpow2.f32 %v43_v37  ;;  %v77_v46 = vpack.c.bf16 %v69_v44, %v69_v44 }
  0x19   :  { %622 = vpow2.f32 %v45_v39  ;;  %v75_v48 = vpack.c.bf16 %v67_v45, %v67_v45  ;;  %v391_v39 = vsel %vm105_vm0, %v586_v38, 0  ;;  %v590_v45 = vld [vmem:[%s814_s1 + $0x10] sm:$0xf] }
  0x1a   :  { %624 = vpow2.f32 %v49_v42  ;;  %87 = vst.msk [vmem:[#allocation2 + $0x8] sm:$0xf] %vm83_vm1, %v77_v46 }
  0x1b   :  { %v615_v47 = vpop.eup %614  ;;  %84 = vst.msk [vmem:[#allocation2] sm:$0xf] %vm83_vm1, %v75_v48 }
  0x1c   :  { %v617_v49 = vpop.eup %616  ;;  %v68_v50 = vmul.f32 %v615_v47, %v20_v14 }
  0x1d   :  { %v619_v51 = vpop.eup %618  ;;  %v70_v52 = vmul.f32 %v617_v49, %v22_v16 }
  0x1e   :  { %v621_v53 = vpop.eup %620  ;;  %v76_v54 = vpack.c.bf16 %v68_v50, %v68_v50  ;;  %v57_v55 = vadd.f32 1.0, %v619_v51  ;;  %v452_v50 = vsel %vm105_vm0, %v590_v45, 0 }
  0x1f   :  { %v623_v56 = vpop.eup %622  ;;  %v78_v57 = vpack.c.bf16 %v70_v52, %v70_v52  ;;  %v55_v58 = vadd.f32 1.0, %v621_v53 }
  0x20   :  { %v625_v59 = vpop.eup %624  ;;  %86 = vst.msk [vmem:[#allocation2 + $0x4] sm:$0x1] %vm85_vm2, %v76_v54  ;;  %626 = vrcp.f32 %v57_v55  ;;  %v56_v60 = vadd.f32 1.0, %v623_v56 }
  0x21   :  { %88 = vst.msk [vmem:[#allocation2 + $0xc] sm:$0x1] %vm85_vm2, %v78_v57  ;;  %628 = vrcp.f32 %v55_v58  ;;  %v58_v61 = vadd.f32 1.0, %v625_v59  ;;  %v751_v62 = vld [vmem:[#allocation2 + $0x8] sm:$0xf] }
  0x22   :  { %630 = vrcp.f32 %v56_v60  ;;  %570 = vmatmul.msk.bf16.vlgmr.msra.gmra.mxu0 %vm101_vm3, %v751_v62  ;;  %v95_v63 = vld [vmem:[#allocation2] sm:$0xf]  ;;  %v177_v1 = vld [vmem:[#allocation2 + $0x8] sm:$0xf] }
  0x23   :  { %632 = vrcp.f32 %v58_v61  ;;  %v141_v0 = vld [vmem:[#allocation2] sm:$0xf]  ;;  %571 = vmatmul.msk.bf16.vlgmr.msra.gmra.mxu1 %vm101_vm3, %v95_v63  ;;  %295 = vmatpush.bf16.msra.mxu0 %v710_v13  ;;  %v183_v7 = vunpack.c.l.b16 %v177_v1  ;;  %v302_v42 = vld [vmem:[#allocation2 + $0x8] sm:$0xe] }
  0x24   :  { %v213_v2 = vld [vmem:[#allocation2] sm:$0xe]  ;;  %v147_v4 = vunpack.c.l.b16 %v141_v0  ;;  %317 = vmatpush.bf16.msra.mxu1 %v224_v36  ;;  %v304_v43 = vunpack.c.l.b16 %v302_v42 }
  0x25   :  { %v217_v12 = vunpack.c.l.b16 %v213_v2 }
  0x26   :  { %v627_v3 = vpop.eup %626 }
  0x27   :  { %v629_v5 = vpop.eup %628  ;;  %v142_v6 = vld [vmem:[#allocation2 + $0x4] sm:$0x1]  ;;  %v73_v8 = vmul.f32 %v627_v3, %v734_v29 }
  0x28   :  { %v631_v9 = vpop.eup %630  ;;  %v148_v10 = vunpack.c.l.b16 %v142_v6  ;;  %v178_v11 = vld [vmem:[#allocation2 + $0xc] sm:$0x1]  ;;  %v71_v14 = vmul.f32 %v629_v5, %v722_v24 }
  0x29   :  { %v633_v15 = vpop.eup %632  ;;  %v184_v16 = vunpack.c.l.b16 %v178_v11  ;;  %v81_v17 = vpack.c.bf16 %v73_v8, %v73_v8  ;;  %v72_v18 = vmul.f32 %v631_v9, %v727_v25  ;;  %v583_v25 = vld [vmem:[%s814_s1 + $0x4] sm:$0xf] }
  0x2a   :  { %v149_v13 = vpack.c.b16 %v148_v10, %v147_v4  ;;  %v79_v19 = vpack.c.bf16 %v71_v14, %v71_v14  ;;  %v74_v20 = vmul.f32 %v633_v15, %v739_v30  ;;  %v218_v27 = vpack.c.b16 %v148_v10, %v217_v12  ;;  %v330_v30 = vld [vmem:[%s814_s1] sm:$0xf] }
  0x2b   :  { %v185_v21 = vpack.c.b16 %v184_v16, %v183_v7  ;;  %91 = vst.msk [vmem:[#allocation2 + $0x18] sm:$0xf] %vm83_vm1, %v81_v17  ;;  %v80_v22 = vpack.c.bf16 %v72_v18, %v72_v18  ;;  %v338_v35 = vsel %vm105_vm0, %v583_v25, 0  ;;  %v357_v37 = vsel %vm105_vm0, %v330_v30, 0 }
  0x2c   :  { %v151_v23 = vshrl.u32 %v149_v13, 16  ;;  %v153_v26 = vshll.u32 %v149_v13, 16  ;;  %89 = vst.msk [vmem:[#allocation2 + $0x10] sm:$0xf] %vm83_vm1, %v79_v19  ;;  %v82_v28 = vpack.c.bf16 %v74_v20, %v74_v20  ;;  %v219_v34 = vrot.slane %v218_v27, 1 }
  0x2d   :  { %v187_v24 = vshrl.u32 %v185_v21, 16  ;;  %v189_v29 = vshll.u32 %v185_v21, 16  ;;  %90 = vst.msk [vmem:[#allocation2 + $0x14] sm:$0x1] %vm85_vm2, %v80_v22  ;;  %v305_v44 = vpack.c.b16 %v184_v16, %v304_v43 }
  0x2e   :  { %v155_v31 = vrot.slane %v153_v26, 1  ;;  %92 = vst.msk [vmem:[#allocation2 + $0x1c] sm:$0x1] %vm85_vm2, %v82_v28 }
  0x2f   :  { %v191_v32 = vrot.slane %v189_v29, 1  ;;  %v306_v53 = vrot.slane %v305_v44, 1 }
  0x30   :  { %v156_v33 = vor.u32 %v155_v31, %v151_v23 }
  0x31   :  { %v192_v36 = vor.u32 %v191_v32, %v187_v24 }
  0x32   :  { %573 = vmatmul.msk.bf16.vlgmr.msra.gmra.mxu2 %vm101_vm3, %v156_v33  ;;  %577 = vmatmul.msk.bf16.vlgmr.msrb.gmra.mxu0 %vm101_vm3, %v219_v34  ;;  %v407_v48 = vld [vmem:[#allocation2 + $0x18] sm:$0xf] }
  0x33   :  { %575 = vmatmul.msk.bf16.vlgmr.msra.gmra.mxu3 %vm101_vm3, %v192_v36  ;;  %347 = vmatpush.bf16.msra.mxu2 %v338_v35  ;;  %v372_v46 = vld [vmem:[#allocation2 + $0x10] sm:$0xf]  ;;  %v412_v54 = vunpack.c.l.b16 %v407_v48  ;;  %v332_v1 = vld [vmem:[#allocation2 + $0x18] sm:$0xf] }
  0x34   :  { %366 = vmatpush.bf16.msra.mxu3 %v357_v37  ;;  %578 = vmatmul.msk.bf16.vlgmr.msrb.gmra.mxu1 %vm101_vm3, %v156_v33  ;;  %v373_v47 = vld [vmem:[#allocation2 + $0x14] sm:$0x1]  ;;  %v377_v51 = vunpack.c.l.b16 %v372_v46  ;;  %v442_v4 = vld [vmem:[#allocation2 + $0x10] sm:$0xe]  ;;  %v524_v8 = vld [vmem:[#allocation2 + $0x18] sm:$0xe] }
  0x35   :  { %400 = vmatpush.bf16.msrb.mxu0 %v391_v39  ;;  %435 = vmatpush.bf16.msrb.mxu1 %v426_v41  ;;  %v408_v49 = vld [vmem:[#allocation2 + $0x1c] sm:$0x1]  ;;  %v378_v52 = vunpack.c.l.b16 %v373_v47  ;;  %v445_v5 = vunpack.c.l.b16 %v442_v4  ;;  %v526_v9 = vunpack.c.l.b16 %v524_v8  ;;  %v600_v33 = vld [vmem:[%s815_s2] ss:$0 sm:$0xff]  ;;  %s660_s2 = smov [#allocation3]  }
  0x36   :  { %v413_v55 = vunpack.c.l.b16 %v408_v49 }
  0x37   :  { %v379_v56 = vpack.c.b16 %v378_v52, %v377_v51  ;;  %v446_v6 = vpack.c.b16 %v378_v52, %v445_v5 }
  0x38   :  { %v414_v57 = vpack.c.b16 %v413_v55, %v412_v54  ;;  %v527_v10 = vpack.c.b16 %v413_v55, %v526_v9 }
  0x39   :  { %v383_v58 = vshll.u32 %v379_v56, 16  ;;  %v381_v60 = vshrl.u32 %v379_v56, 16  ;;  %v447_v7 = vrot.slane %v446_v6, 1 }
  0x3a   :  { %v418_v59 = vshll.u32 %v414_v57, 16  ;;  %v416_v63 = vshrl.u32 %v414_v57, 16  ;;  %v528_v11 = vrot.slane %v527_v10, 1 }
  0x3b   :  { %v385_v61 = vrot.slane %v383_v58, 1 }
  0x3c   :  { %v420_v0 = vrot.slane %v418_v59, 1 }
  0x3d   :  { %v386_v2 = vor.u32 %v385_v61, %v381_v60 }
  0x3e   :  { %v421_v3 = vor.u32 %v420_v0, %v416_v63 }
  0x42   :  { %579 = vmatmul.msk.bf16.vlgmr.msrb.gmra.mxu2 %vm101_vm3, %v751_v62  ;;  %581 = vmatmul.msk.bf16.vlgmr.msra.gmra.mxu0 %vm101_vm3, %v219_v34  ;;  %v329_v62 = vld [vmem:[#allocation2 + $0x10] sm:$0xf] }
  0x43   :  { %580 = vmatmul.msk.bf16.vlgmr.msrb.gmra.mxu3 %vm101_vm3, %v192_v36  ;;  %461 = vmatpush.bf16.msrb.mxu2 %v452_v50 }
  0x44   :  { %477 = vmatpush.bf16.msrb.mxu3 %v338_v35  ;;  %582 = vmatmul.msk.bf16.vlgmr.msra.gmra.mxu1 %vm101_vm3, %v306_v53 }
  0x45   :  { %490 = vmatpush.bf16.msra.mxu0 %v357_v37  ;;  %503 = vmatpush.bf16.msra.mxu1 %v391_v39  ;;  %v601_v39 = vld [vmem:[%s816_s3] ss:$0 sm:$0xff]  ;;  %s555_s3 = sshll.u32 %s660_s2, 4  ;;  %s556_s3 = int_to_ptr.vmem [resolvable:$true] %s555_s3 }
  0x52   :  { %584 = vmatmul.msk.bf16.vlgmr.msra.gmra.mxu2 %vm101_vm3, %v332_v1  ;;  %587 = vmatmul.msk.bf16.vlgmr.msrb.gmra.mxu0 %vm101_vm3, %v386_v2 }
  0x53   :  { %585 = vmatmul.msk.bf16.vlgmr.msra.gmra.mxu3 %vm101_vm3, %v329_v62  ;;  %517 = vmatpush.bf16.msra.mxu2 %v426_v41 }
  0x54   :  { %539 = vmatpush.bf16.msra.mxu3 %v452_v50  ;;  %589 = vmatmul.msk.bf16.vlgmr.msrb.gmra.mxu1 %vm101_vm3, %v421_v3 }
  0x62   :  { %591 = vmatmul.msk.bf16.vlgmr.msrb.gmra.mxu2 %vm101_vm3, %v447_v7  ;;  %593 = vmatmul.msk.bf16.vlgmr.msra.gmra.mxu0 %vm101_vm3, %v332_v1 }
  0x63   :  { %592 = vmatmul.msk.bf16.vlgmr.msrb.gmra.mxu3 %vm101_vm3, %v386_v2 }
  0x64   :  { %594 = vmatmul.msk.bf16.vlgmr.msra.gmra.mxu1 %vm101_vm3, %v421_v3 }
  0x72   :  { %595 = vmatmul.msk.bf16.vlgmr.msra.gmra.mxu2 %vm101_vm3, %v447_v7 }
  0x73   :  { %596 = vmatmul.msk.bf16.vlgmr.msra.gmra.mxu3 %vm101_vm3, %v528_v11 }
  0x9f   :  { %v118_v12 = vpop.f32.mrf.mxu0 }
  0xa0   :  { %v137_v14 = vpop.f32.mrf.mxu1 }
  0xa1   :  { %v138_v23 = vadd.f32 %v137_v14, %v118_v12 }
  0xa7   :  { %v120_v15 = vpop.f32.mrf.mxu0 }
  0xa8   :  { %v139_v16 = vpop.f32.mrf.mxu1 }
  0xaf   :  { %v235_v17 = vpop.f32.mrf.mxu0 }
  0xb1   :  { %v257_v18 = vpop.f32.mrf.mxu1 }
  0xb5   :  { %v172_v13 = vpop.f32.mrf.mxu2 }
  0xb6   :  { %v208_v19 = vpop.f32.mrf.mxu3  ;;  %v176_v27 = vadd.f32 %v172_v13, %v138_v23 }
  0xb7   :  { %v237_v20 = vpop.f32.mrf.mxu0 }
  0xb8   :  { %v212_v29 = vadd.f32 %v208_v19, %v176_v27 }
  0xb9   :  { %v259_v21 = vpop.f32.mrf.mxu1 }
  0xba   :  { %v239_v32 = vadd.f32 %v235_v17, %v212_v29 }
  0xbc   :  { %v243_v38 = vmul.f32 %v600_v33, %v239_v32 }
  0xbd   :  { %v174_v22 = vpop.f32.mrf.mxu2 }
  0xbe   :  { %v210_v26 = vpop.f32.mrf.mxu3  ;;  %v247_v44 = vadd.f32 %v601_v39, %v243_v38 }
  0xbf   :  { %v297_v28 = vpop.f32.mrf.mxu0 }
  0xc1   :  { %v319_v24 = vpop.f32.mrf.mxu1 }
  0xc5   :  { %v270_v25 = vpop.f32.mrf.mxu2 }
  0xc6   :  { %v271_v31 = vadd.f32 %v270_v25, %v257_v18  ;;  %v283_v30 = vpop.f32.mrf.mxu3 }
  0xc7   :  { %v299_v35 = vpop.f32.mrf.mxu0 }
  0xc8   :  { %v287_v34 = vadd.f32 %v283_v30, %v271_v31 }
  0xc9   :  { %v321_v37 = vpop.f32.mrf.mxu1 }
  0xca   :  { %v301_v36 = vadd.f32 %v297_v28, %v287_v34 }
  0xcc   :  { %v323_v40 = vadd.f32 %v319_v24, %v301_v36 }
  0xcd   :  { %v272_v41 = vpop.f32.mrf.mxu2 }
  0xce   :  { %v324_v42 = vmul.f32 %v600_v33, %v323_v40  ;;  %v285_v43 = vpop.f32.mrf.mxu3 }
  0xcf   :  { %v402_v46 = vpop.f32.mrf.mxu0 }
  0xd0   :  { %v325_v45 = vadd.f32 %v601_v39, %v324_v42 }
  0xd1   :  { %v437_v48 = vpop.f32.mrf.mxu1 }
  0xd2   :  { %v326_v47 = vmax.f32 %v247_v44, %v325_v45 }
  0xd4   :  { %327 = vst [vmem:[#allocation3] sm:$0xff] %v326_v47 }
  0xd5   :  { %v349_v49 = vpop.f32.mrf.mxu2 }
  0xd6   :  { %v368_v50 = vpop.f32.mrf.mxu3 }
  0xd7   :  { %v404_v51 = vpop.f32.mrf.mxu0  ;;  %v369_v60 = vadd.f32 %v368_v50, %v349_v49 }
  0xd9   :  { %v439_v52 = vpop.f32.mrf.mxu1  ;;  %v406_v0 = vadd.f32 %v402_v46, %v369_v60 }
  0xdb   :  { %v441_v2 = vadd.f32 %v437_v48, %v406_v0 }
  0xdd   :  { %v351_v53 = vpop.f32.mrf.mxu2 }
  0xde   :  { %v370_v54 = vpop.f32.mrf.mxu3 }
  0xdf   :  { %v492_v55 = vpop.f32.mrf.mxu0 }
  0xe1   :  { %v505_v56 = vpop.f32.mrf.mxu1 }
  0xe5   :  { %v463_v57 = vpop.f32.mrf.mxu2 }
  0xe6   :  { %v479_v58 = vpop.f32.mrf.mxu3  ;;  %v467_v3 = vadd.f32 %v463_v57, %v441_v2 }
  0xe7   :  { %v494_v59 = vpop.f32.mrf.mxu0  ;;  %v493_v62 = vadd.f32 %v492_v55, %v479_v58 }
  0xe8   :  { %v468_v8 = vmul.f32 %v600_v33, %v467_v3 }
  0xe9   :  { %v507_v61 = vpop.f32.mrf.mxu1  ;;  %v509_v4 = vadd.f32 %v505_v56, %v493_v62 }
  0xea   :  { %v469_v11 = vadd.f32 %v601_v39, %v468_v8 }
  0xed   :  { %v465_v63 = vpop.f32.mrf.mxu2 }
  0xee   :  { %v481_v1 = vpop.f32.mrf.mxu3 }
  0xf5   :  { %v519_v5 = vpop.f32.mrf.mxu2 }
  0xf6   :  { %v523_v6 = vadd.f32 %v519_v5, %v509_v4  ;;  %v541_v7 = vpop.f32.mrf.mxu3 }
  0xf8   :  { %v545_v9 = vadd.f32 %v541_v7, %v523_v6 }
  0xfa   :  { %v546_v10 = vmul.f32 %v600_v33, %v545_v9 }
  0xfc   :  { %v547_v12 = vadd.f32 %v601_v39, %v546_v10 }
  0xfd   :  { %v521_v14 = vpop.f32.mrf.mxu2 }
  0xfe   :  { %v548_v15 = vmax.f32 %v469_v11, %v547_v12  ;;  %v543_v16 = vpop.f32.mrf.mxu3 }
 0x100   :  { %550 = vst [vmem:[#allocation3 + $0x8] sm:$0xff] %v548_v15 }
 0x101   :  { %563 = dma.vmem_to_hbm [thread:$0]  %s556_s3, 256, %s558_s29, [#allocation4], %s661_s30, %s661_s30, %s662_s5  }
 0x102   :  { %658 = dma.done.wait [#allocation4], 256  }
 0x103   :  { %659 = vsyncadd [#allocation4], 4294967040 }
 0x104   :  { %568 = vsyncpa [#allocation4], 1 }

</bundles_post_ra>
